<compile_context>
chip_gen: v7x
topology: tpu7x:2x2x1
jax: 0.10.0
libtpu: 0.0.40
codegen_flags: <defaults>
</compile_context>

<pallas_src>
import functools
import numpy as np

import jax
import jax.numpy as jnp
from jax.experimental import pallas as pl
from jax.experimental.pallas import tpu as pltpu

_EPS = 1e-5                       # nn.LayerNorm default eps
_VMEM_LIMIT = 32 * 1024 * 1024    # scoped-VMEM budget: safe on v5e/v6e/v7x
_ROW_TILE_CAP = 512               # row tile target (multiple of 8, pipelined)
_MXU_DTYPE = jnp.bfloat16         # MXU operand dtype (f32 accumulation everywhere)
_WEIGHT_DTYPE = jnp.bfloat16      # matmul weights stored bf16 in HBM


def _compiler_params():
    return pltpu.CompilerParams(
        dimension_semantics=("parallel",),   # shard grid across TCs (v7x megacore)
        vmem_limit_bytes=_VMEM_LIMIT)


def _cost(flops, bytes_accessed, transcendentals=0):
    return pl.CostEstimate(flops=int(flops), transcendentals=int(transcendentals),
                           bytes_accessed=int(bytes_accessed))


def _ceil_to(v, m):
    return ((v + m - 1) // m) * m


def _row_plan(rows, cap=_ROW_TILE_CAP):
    """Sublane-aligned row tile + padded row count.  Guarantees a pipelined,
    VMEM-safe tiling for any row count and a grid of >=2 steps when possible."""
    r8 = _ceil_to(rows, 8)
    grid = max(1, -(-r8 // cap))
    if grid == 1 and r8 >= 16:
        grid = 2                              # let v7x split across both cores
    tm = _ceil_to(-(-r8 // grid), 8)
    return tm, tm * grid


def _pad_rows(x, padded_rows):
    pad = padded_rows - x.shape[0]
    return jnp.pad(x, ((0, pad), (0, 0))) if pad else x


def _window_tile(bw, limit, cap):
    """Largest window-block size dividing `limit` (and `bw`), <= cap, keeping
    the grid >= 2 steps so both v7x TensorCores get work."""
    best = 1
    for t in range(1, min(limit, cap, bw) + 1):
        if limit % t == 0 and bw % t == 0 and bw // t >= 2:
            best = t
    return best


# ----------------------------------------------------------------------------
# In-kernel math helpers (all f32: v5e has no bf16 VPU/EUP)
# ----------------------------------------------------------------------------

def _layernorm(x_f32, gamma, beta):
    mean = jnp.mean(x_f32, axis=-1, keepdims=True)
    var = jnp.mean(jnp.square(x_f32 - mean), axis=-1, keepdims=True)
    return (x_f32 - mean) * jax.lax.rsqrt(var + _EPS) * gamma + beta


def _erf_f32(x):
    # Abramowitz & Stegun 7.1.26, |err| <= 1.5e-7 (~f32 eps).
    t = 1.0 / (1.0 + 0.3275911 * jnp.abs(x))
    poly = t * (0.254829592 + t * (-0.284496736 + t * (1.421413741 +
               t * (-1.453152027 + t * 1.061405429))))
    e = 1.0 - poly * jnp.exp(-x * x)
    return jnp.where(x < 0.0, -e, e)


def _gelu_exact(x):
    return 0.5 * x * (1.0 + _erf_f32(x * 0.7071067811865476))


# ----------------------------------------------------------------------------
# Pallas kernels
# ----------------------------------------------------------------------------

def _linear_kernel(x_ref, w_ref, b_ref, o_ref):
    acc = jnp.dot(x_ref[...].astype(_MXU_DTYPE), w_ref[...].astype(_MXU_DTYPE),
                  preferred_element_type=jnp.float32)
    o_ref[...] = (acc + b_ref[...]).astype(o_ref.dtype)


def _ln_linear_kernel(x_ref, g_ref, b_ref, w_ref, bias_ref, o_ref):
    y = _layernorm(x_ref[...].astype(jnp.float32), g_ref[...], b_ref[...])
    acc = jnp.dot(y.astype(_MXU_DTYPE), w_ref[...].astype(_MXU_DTYPE),
                  preferred_element_type=jnp.float32)
    o_ref[...] = (acc + bias_ref[...]).astype(o_ref.dtype)


def _ln_linear_nobias_kernel(x_ref, g_ref, b_ref, w_ref, o_ref):
    y = _layernorm(x_ref[...].astype(jnp.float32), g_ref[...], b_ref[...])
    acc = jnp.dot(y.astype(_MXU_DTYPE), w_ref[...].astype(_MXU_DTYPE),
                  preferred_element_type=jnp.float32)
    o_ref[...] = acc.astype(o_ref.dtype)


def _ln_mlp_residual_kernel(x_ref, g_ref, b_ref, w1_ref, b1_ref, w2_ref, b2_ref,
                            o_ref):
    x = x_ref[...].astype(jnp.float32)
    y = _layernorm(x, g_ref[...], b_ref[...])
    h = jnp.dot(y.astype(_MXU_DTYPE), w1_ref[...].astype(_MXU_DTYPE),
                preferred_element_type=jnp.float32) + b1_ref[...]
    h = _gelu_exact(h)                                   # exact (erf) GELU, f32
    out = jnp.dot(h.astype(_MXU_DTYPE), w2_ref[...].astype(_MXU_DTYPE),
                  preferred_element_type=jnp.float32) + b2_ref[...]
    o_ref[...] = (x + out).astype(o_ref.dtype)           # residual fused in
    # TODO(synk): for production dims (C>=512, hidden=4C) on v7x (64 MiB VMEM),
    # block the hidden axis as an extra grid dim instead of full-resident w1/w2.


def _attn_compute(x, gamma, beta, qw, qb, rel, mask, pw, pb, num_heads, scale):
    """Fused LN1 + QKV + window attention + output projection on a block of
    windows.  x: (WT, N, C) f32; per-head einsums are batched over windows."""
    wt, n, c = x.shape
    hd = c // num_heads
    y = _layernorm(x, gamma, beta)                       # (wt, n, c) f32
    qkv = jnp.dot(y.reshape(wt * n, c).astype(_MXU_DTYPE), qw.astype(_MXU_DTYPE),
                  preferred_element_type=jnp.float32) + qb
    qkv = qkv.reshape(wt, n, 3 * c)

    heads = []
    for h in range(num_heads):                           # nh is small; static unroll
        q = qkv[:, :, h * hd:(h + 1) * hd] * scale
        k = qkv[:, :, c + h * hd:c + (h + 1) * hd]
        v = qkv[:, :, 2 * c + h * hd:2 * c + (h + 1) * hd]
        s = jnp.einsum('wnd,wmd->wnm', q.astype(_MXU_DTYPE), k.astype(_MXU_DTYPE),
                       preferred_element_type=jnp.float32)
        s = s + rel[h]
        if mask is not None:
            s = s + mask
        s = s - jnp.max(s, axis=-1, keepdims=True)       # softmax in f32
        p = jnp.exp(s)
        p = p * pl.reciprocal(jnp.sum(p, axis=-1, keepdims=True), approx=True)
        heads.append(jnp.einsum('wnm,wmd->wnd', p.astype(_MXU_DTYPE),
                                v.astype(_MXU_DTYPE),
                                preferred_element_type=jnp.float32))
    ctx = jnp.concatenate(heads, axis=-1).reshape(wt * n, c)
    out = jnp.dot(ctx.astype(_MXU_DTYPE), pw.astype(_MXU_DTYPE),
                  preferred_element_type=jnp.float32) + pb
    return out.reshape(wt, n, c)


def _ln_attn_kernel(x_ref, g_ref, b_ref, qw_ref, qb_ref, rel_ref, pw_ref, pb_ref,
                    o_ref, *, num_heads, scale):
    out = _attn_compute(x_ref[...].astype(jnp.float32), g_ref[...], b_ref[...],
                        qw_ref[...], qb_ref[...], rel_ref[...], None,
                        pw_ref[...], pb_ref[...], num_heads, scale)
    o_ref[...] = out.astype(o_ref.dtype)


def _ln_attn_mask_kernel(x_ref, g_ref, b_ref, qw_ref, qb_ref, rel_ref, mask_ref,
                         pw_ref, pb_ref, o_ref, *, num_heads, scale):
    out = _attn_compute(x_ref[...].astype(jnp.float32), g_ref[...], b_ref[...],
                        qw_ref[...], qb_ref[...], rel_ref[...],
                        mask_ref[...].astype(jnp.float32),
                        pw_ref[...], pb_ref[...], num_heads, scale)
    o_ref[...] = out.astype(o_ref.dtype)


def _ln_pool_head_kernel(x_ref, g_ref, b_ref, w_ref, hb_ref, o_ref):
    x = x_ref[...].astype(jnp.float32)                   # (1, L, C)
    y = _layernorm(x, g_ref[...], b_ref[...])
    pooled = jnp.mean(y, axis=1)                         # (1, C) spatial mean
    logits = jnp.dot(pooled.astype(_MXU_DTYPE), w_ref[...].astype(_MXU_DTYPE),
                     preferred_element_type=jnp.float32) + hb_ref[...]
    o_ref[0] = logits.astype(o_ref.dtype)


# ----------------------------------------------------------------------------
# pallas_call wrappers (gridded, pipelined, "parallel" semantics)
# ----------------------------------------------------------------------------

def linear_pallas(x, w, b):
    m, k = x.shape
    n = w.shape[1]
    tm, mp = _row_plan(m)
    xp = _pad_rows(x, mp)
    out = pl.pallas_call(
        _linear_kernel,
        out_shape=jax.ShapeDtypeStruct((mp, n), x.dtype),
        grid=(mp // tm,),
        in_specs=[pl.BlockSpec((tm, k), lambda i: (i, 0)),
                  pl.BlockSpec((k, n), lambda i: (0, 0)),
                  pl.BlockSpec((1, n), lambda i: (0, 0))],
        out_specs=pl.BlockSpec((tm, n), lambda i: (i, 0)),
        compiler_params=_compiler_params(),
        cost_estimate=_cost(2 * mp * k * n,
                            xp.nbytes + w.nbytes + b.nbytes + mp * n * 4),
    )(xp, w, b.reshape(1, n))
    return out[:m] if mp != m else out


def ln_linear_pallas(x, gamma, beta, w, b=None):
    m, k = x.shape
    n = w.shape[1]
    tm, mp = _row_plan(m)
    xp = _pad_rows(x, mp)
    in_specs = [pl.BlockSpec((tm, k), lambda i: (i, 0)),
                pl.BlockSpec((1, k), lambda i: (0, 0)),
                pl.BlockSpec((1, k), lambda i: (0, 0)),
                pl.BlockSpec((k, n), lambda i: (0, 0))]
    args = [xp, gamma.reshape(1, k), beta.reshape(1, k), w]
    byt = xp.nbytes + w.nbytes + 8 * k + mp * n * 4
    if b is None:
        kernel = _ln_linear_nobias_kernel                # skip synthetic zero bias
    else:
        kernel = _ln_linear_kernel
        in_specs.append(pl.BlockSpec((1, n), lambda i: (0, 0)))
        args.append(b.reshape(1, n))
        byt += b.nbytes
    out = pl.pallas_call(
        kernel,
        out_shape=jax.ShapeDtypeStruct((mp, n), x.dtype),
        grid=(mp // tm,),
        in_specs=in_specs,
        out_specs=pl.BlockSpec((tm, n), lambda i: (i, 0)),
        compiler_params=_compiler_params(),
        cost_estimate=_cost(2 * mp * k * n + 8 * mp * k, byt),
    )(*args)
    return out[:m] if mp != m else out


def ln_mlp_residual_pallas(x, gamma, beta, w1, b1, w2, b2):
    m, c = x.shape
    hdim = w1.shape[1]
    tm, mp = _row_plan(m)
    xp = _pad_rows(x, mp)
    byt = (xp.nbytes + w1.nbytes + w2.nbytes + b1.nbytes + b2.nbytes
           + 8 * c + mp * c * 4)
    out = pl.pallas_call(
        _ln_mlp_residual_kernel,
        out_shape=jax.ShapeDtypeStruct((mp, c), x.dtype),
        grid=(mp // tm,),
        in_specs=[pl.BlockSpec((tm, c), lambda i: (i, 0)),
                  pl.BlockSpec((1, c), lambda i: (0, 0)),
                  pl.BlockSpec((1, c), lambda i: (0, 0)),
                  pl.BlockSpec((c, hdim), lambda i: (0, 0)),
                  pl.BlockSpec((1, hdim), lambda i: (0, 0)),
                  pl.BlockSpec((hdim, c), lambda i: (0, 0)),
                  pl.BlockSpec((1, c), lambda i: (0, 0))],
        out_specs=pl.BlockSpec((tm, c), lambda i: (i, 0)),
        compiler_params=_compiler_params(),
        cost_estimate=_cost(4 * mp * c * hdim + 40 * mp * hdim + 8 * mp * c, byt,
                            transcendentals=mp * hdim),
    )(xp, gamma.reshape(1, c), beta.reshape(1, c), w1, b1.reshape(1, hdim),
      w2, b2.reshape(1, c))
    return out[:m] if mp != m else out


def ln_window_attention_pallas(xw, gamma, beta, qkv_w, qkv_b, rel_bias, attn_mask,
                               proj_w, proj_b, *, num_heads, scale):
    """Fused LN1 + QKV + window attention + proj over blocks of windows."""
    bw, n_tok, c = xw.shape
    shifted = attn_mask is not None
    limit = int(attn_mask.shape[0]) if shifted else bw   # mask period (windows/img)
    wt = _window_tile(bw, limit, cap=max(1, _ROW_TILE_CAP // n_tok))
    grid = (bw // wt,)

    in_specs = [pl.BlockSpec((wt, n_tok, c), lambda i: (i, 0, 0)),
                pl.BlockSpec((1, 1, c), lambda i: (0, 0, 0)),
                pl.BlockSpec((1, 1, c), lambda i: (0, 0, 0)),
                pl.BlockSpec((c, 3 * c), lambda i: (0, 0)),
                pl.BlockSpec((1, 3 * c), lambda i: (0, 0)),
                pl.BlockSpec((num_heads, n_tok, n_tok), lambda i: (0, 0, 0))]
    args = [xw, gamma.reshape(1, 1, c), beta.reshape(1, 1, c),
            qkv_w, qkv_b.reshape(1, 3 * c), rel_bias]
    mask_bytes = 0
    if shifted:
        nmb = limit // wt                                # shift mask picked per block
        in_specs.append(pl.BlockSpec((wt, n_tok, n_tok),
                                     lambda i, nmb=nmb: (i % nmb, 0, 0)))
        args.append(attn_mask)
        mask_bytes = attn_mask.nbytes
        kernel = functools.partial(_ln_attn_mask_kernel,
                                   num_heads=num_heads, scale=scale)
    else:                                                # no-mask variant: no DMA/add
        kernel = functools.partial(_ln_attn_kernel,
                                   num_heads=num_heads, scale=scale)
    in_specs += [pl.BlockSpec((c, c), lambda i: (0, 0)),
                 pl.BlockSpec((1, c), lambda i: (0, 0))]
    args += [proj_w, proj_b.reshape(1, c)]

    flops = bw * (2 * n_tok * c * 3 * c + 4 * n_tok * n_tok * c
                  + 2 * n_tok * c * c + 8 * n_tok * c)
    byt = (xw.nbytes + qkv_w.nbytes + proj_w.nbytes + rel_bias.nbytes
           + mask_bytes + bw * n_tok * c * 4)
    return pl.pallas_call(
        kernel,
        out_shape=jax.ShapeDtypeStruct((bw, n_tok, c), xw.dtype),
        grid=grid,
        in_specs=in_specs,
        out_specs=pl.BlockSpec((wt, n_tok, c), lambda i: (i, 0, 0)),
        compiler_params=_compiler_params(),
        cost_estimate=_cost(flops, byt,
                            transcendentals=bw * num_heads * n_tok * n_tok),
    )(*args)


def ln_pool_head_pallas(x, gamma, beta, w, b, ncls):
    bsz, l, c = x.shape
    npad = w.shape[1]                                    # padded to 128 lanes at init
    out = pl.pallas_call(
        _ln_pool_head_kernel,
        out_shape=jax.ShapeDtypeStruct((bsz, 1, npad), x.dtype),
        grid=(bsz,),
        in_specs=[pl.BlockSpec((1, l, c), lambda i: (i, 0, 0)),
                  pl.BlockSpec((1, 1, c), lambda i: (0, 0, 0)),
                  pl.BlockSpec((1, 1, c), lambda i: (0, 0, 0)),
                  pl.BlockSpec((c, npad), lambda i: (0, 0)),
                  pl.BlockSpec((1, npad), lambda i: (0, 0))],
        out_specs=pl.BlockSpec((1, 1, npad), lambda i: (i, 0, 0)),
        compiler_params=_compiler_params(),
        cost_estimate=_cost(2 * bsz * c * npad + 8 * bsz * l * c,
                            x.nbytes + w.nbytes + b.nbytes + bsz * npad * 4),
    )(x, gamma.reshape(1, 1, c), beta.reshape(1, 1, c), w, b.reshape(1, npad))
    return out.reshape(bsz, npad)[:, :ncls]              # drop lane padding


# ----------------------------------------------------------------------------
# Glue: precomputed window permutations / masks / relative position index
# ----------------------------------------------------------------------------

def relative_position_index(ws):
    coords = np.stack(np.meshgrid(np.arange(ws), np.arange(ws), indexing='ij'))
    coords_flat = coords.reshape(2, -1)
    rel = coords_flat[:, :, None] - coords_flat[:, None, :]
    rel = rel.transpose(1, 2, 0).astype(np.int32)
    rel[..., 0] += ws - 1
    rel[..., 1] += ws - 1
    rel[..., 0] *= 2 * ws - 1
    return rel.sum(-1)                                   # (N, N)


def compute_attn_mask(H, W, ws, ss):
    img_mask = np.zeros((1, H, W, 1), np.float32)
    cnt = 0
    for h in (slice(0, -ws), slice(-ws, -ss), slice(-ss, None)):
        for w in (slice(0, -ws), slice(-ws, -ss), slice(-ss, None)):
            img_mask[:, h, w, :] = cnt
            cnt += 1
    m = img_mask.reshape(1, H // ws, ws, W // ws, ws, 1)
    m = m.transpose(0, 1, 3, 2, 4, 5).reshape(-1, ws * ws)
    attn_mask = m[:, None, :] - m[:, :, None]
    attn_mask = np.where(attn_mask != 0, -100.0, 0.0).astype(np.float32)
    return jnp.asarray(attn_mask)                        # (nW, N, N)


def shift_window_permutation(H, W, ws, ss):
    """Single token gather combining cyclic shift + window partition (+ inverse)."""
    idx = np.arange(H * W, dtype=np.int32).reshape(H, W)
    if ss > 0:
        idx = np.roll(idx, shift=(-ss, -ss), axis=(0, 1))
    perm = idx.reshape(H // ws, ws, W // ws, ws).transpose(0, 2, 1, 3).reshape(-1)
    inv = np.argsort(perm).astype(np.int32)
    return jnp.asarray(perm), jnp.asarray(inv)


# ----------------------------------------------------------------------------
# Model blocks
# ----------------------------------------------------------------------------

def swin_block_forward(x, bp):
    B, H, W, C = x.shape
    ws, nh = bp['ws'], bp['num_heads']
    n_tok = ws * ws
    nwin = (H // ws) * (W // ws)
    scale = (C // nh) ** -0.5

    shortcut = x
    # cyclic shift + window partition as one precomputed gather
    # TODO(synk): these two gathers could be folded into the Pallas calls with
    # scalar-prefetched index_maps; kept as XLA gathers for robustness.
    x_tok = x.reshape(B, H * W, C)
    xw = jnp.take(x_tok, bp['perm'], axis=1).reshape(B * nwin, n_tok, C)

    # fused LN1 + QKV + window attention (+rel bias, +shift mask) + projection
    attn = ln_window_attention_pallas(
        xw, bp['norm1_g'], bp['norm1_b'], bp['qkv_w'], bp['qkv_b'],
        bp['rel_bias'], bp['attn_mask'], bp['proj_w'], bp['proj_b'],
        num_heads=nh, scale=scale)

    # window reverse + inverse cyclic shift as one gather, then residual add
    attn_tok = attn.reshape(B, H * W, C)
    x = shortcut + jnp.take(attn_tok, bp['inv_perm'], axis=1).reshape(B, H, W, C)

    # fused LayerNorm2 + FC1 + exact GELU + FC2 + residual
    x = ln_mlp_residual_pallas(x.reshape(B * H * W, C),
                               bp['norm2_g'], bp['norm2_b'],
                               bp['fc1_w'], bp['fc1_b'], bp['fc2_w'], bp['fc2_b'])
    return x.reshape(B, H, W, C)


def patch_merging_forward(x, dp):
    B, H, W, C = x.shape                                 # H, W even in this config
    x0 = x[:, 0::2, 0::2, :]
    x1 = x[:, 1::2, 0::2, :]
    x2 = x[:, 0::2, 1::2, :]
    x3 = x[:, 1::2, 1::2, :]
    x = jnp.concatenate([x0, x1, x2, x3], axis=-1)       # (B, H/2, W/2, 4C)
    # fused LayerNorm + bias-free reduction Linear(4C -> 2C)
    xf = ln_linear_pallas(x.reshape(-1, 4 * C), dp['norm_g'], dp['norm_b'],
                          dp['red_w'], None)
    return xf.reshape(B, H // 2, W // 2, 2 * C)


def swin_forward(x, params, cfg):
    B, Cin, H, W = x.shape
    pd = cfg['patch_size']
    nh_, nw_ = H // pd, W // pd
    # PatchEmbed: stride-p conv == unfold patches (C, p, p order) + matmul
    patches = x.reshape(B, Cin, nh_, pd, nw_, pd)
    patches = jnp.transpose(patches, (0, 2, 4, 1, 3, 5)).reshape(
        B * nh_ * nw_, Cin * pd * pd)
    feat = linear_pallas(patches, params['patch_w'], params['patch_b'])
    x = feat.reshape(B, nh_, nw_, cfg['embed_dim'])      # (B, H', W', C)

    for layer in params['layers']:
        for bp in layer['blocks']:
            x = swin_block_forward(x, bp)
        if layer['downsample'] is not None:
            x = patch_merging_forward(x, layer['downsample'])

    Bc, Hc, Wc, Cc = x.shape
    # fused final LayerNorm + spatial mean-pool + classifier head (lane-padded)
    return ln_pool_head_pallas(x.reshape(Bc, Hc * Wc, Cc),
                               params['norm_g'], params['norm_b'],
                               params['head_w'], params['head_b'],
                               cfg['num_classes'])


# ----------------------------------------------------------------------------
# Deterministic parameter initialization (synthetic weights)
# ----------------------------------------------------------------------------

CFG = dict(img_size=16, patch_size=4, in_channels=3, num_classes=8,
           embed_dim=16, depths=(2, 2), num_heads=(2, 4), window_size=2,
           mlp_ratio=4.0)


def init_params(key, cfg):
    keys = iter(jax.random.split(key, 512))

    def nrm(shape, scale=0.02, dtype=jnp.float32):
        return (scale * jax.random.normal(next(keys), shape)).astype(dtype)

    pd, cin, ed = cfg['patch_size'], cfg['in_channels'], cfg['embed_dim']
    p = {
        'patch_w': nrm((cin * pd * pd, ed), dtype=_WEIGHT_DTYPE),
        'patch_b': jnp.zeros((ed,), jnp.float32),
    }

    res = cfg['img_size'] // pd
    layers = []
    for li, depth in enumerate(cfg['depths']):
        dim = ed * (2 ** li)
        nh = cfg['num_heads'][li]
        H = W = res // (2 ** li)
        ws0 = cfg['window_size']
        hidden = int(dim * cfg['mlp_ratio'])
        blocks = []
        for bi in range(depth):
            ss = 0 if bi % 2 == 0 else ws0 // 2
            ws_eff, ss_eff = ws0, ss
            if min(H, W) <= ws0:                         # standard Swin adjustment
                ws_eff, ss_eff = min(H, W), 0
            n_tok = ws_eff * ws_eff
            # relative-position bias precomputed once per block: (nh, N, N) f32
            rel_table = nrm(((2 * ws_eff - 1) ** 2, nh))
            rel_idx = relative_position_index(ws_eff).reshape(-1)
            rel_bias = jnp.transpose(
                rel_table[jnp.asarray(rel_idx)].reshape(n_tok, n_tok, nh), (2, 0, 1))
            attn_mask = (compute_attn_mask(H, W, ws_eff, ss_eff)
                         if ss_eff > 0 else None)        # None -> no-mask kernel
            perm, inv_perm = shift_window_permutation(H, W, ws_eff, ss_eff)
            bp = dict(
                ws=ws_eff, num_heads=nh,
                perm=perm, inv_perm=inv_perm,
                rel_bias=rel_bias, attn_mask=attn_mask,
                norm1_g=jnp.ones((dim,), jnp.float32),
                norm1_b=jnp.zeros((dim,), jnp.float32),
                qkv_w=nrm((dim, 3 * dim), dtype=_WEIGHT_DTYPE),
                qkv_b=jnp.zeros((3 * dim,), jnp.float32),
                proj_w=nrm((dim, dim), dtype=_WEIGHT_DTYPE),
                proj_b=jnp.zeros((dim,), jnp.float32),
                norm2_g=jnp.ones((dim,), jnp.float32),
                norm2_b=jnp.zeros((dim,), jnp.float32),
                fc1_w=nrm((dim, hidden), dtype=_WEIGHT_DTYPE),
                fc1_b=jnp.zeros((hidden,), jnp.float32),
                fc2_w=nrm((hidden, dim), dtype=_WEIGHT_DTYPE),
                fc2_b=jnp.zeros((dim,), jnp.float32),
            )
            blocks.append(bp)
        down = None
        if li < len(cfg['depths']) - 1:
            down = dict(
                norm_g=jnp.ones((4 * dim,), jnp.float32),
                norm_b=jnp.zeros((4 * dim,), jnp.float32),
                red_w=nrm((4 * dim, 2 * dim), dtype=_WEIGHT_DTYPE),
            )
        layers.append(dict(blocks=blocks, downsample=down))
    p['layers'] = layers

    nf = ed * (2 ** (len(cfg['depths']) - 1))
    p['norm_g'] = jnp.ones((nf,), jnp.float32)
    p['norm_b'] = jnp.zeros((nf,), jnp.float32)
    # classifier padded to 128 output lanes -> lane-dense stores; sliced outside
    # TODO(synk): AttentionFC source not provided; implemented as a plain Linear head.
    ncls = cfg['num_classes']
    ncls_pad = _ceil_to(ncls, 128)
    head_w = jnp.zeros((nf, ncls_pad), jnp.float32).at[:, :ncls].set(nrm((nf, ncls)))
    p['head_w'] = head_w.astype(_WEIGHT_DTYPE)
    p['head_b'] = jnp.zeros((ncls_pad,), jnp.float32)
    return p


if __name__ == "__main__":
    key = jax.random.PRNGKey(0)
    kx, kp = jax.random.split(key)
    x = jax.random.normal(
        kx, (2, CFG['in_channels'], CFG['img_size'], CFG['img_size']), jnp.float32)
    params = init_params(kp, CFG)
    out = swin_forward(x, params, CFG)
    out = jax.block_until_ready(out)
    assert out.shape == (2, CFG['num_classes']) and out.dtype == jnp.float32
    print("KERNEL_OK")
</pallas_src>

<mosaic_0001>
module attributes {stable_mosaic.version = 11 : i64} {
  func.func @_linear_kernel(%arg0: i32, %arg1: memref<16x48xf32, #tpu.memory_space<vmem>>, %arg2: memref<48x16xbf16, #tpu.memory_space<vmem>>, %arg3: memref<1x16xf32, #tpu.memory_space<vmem>>, %arg4: memref<16x16xf32, #tpu.memory_space<vmem>>) attributes {dimension_semantics = [#tpu.dimension_semantics<parallel>], iteration_bounds = array<i64: 2>, scalar_prefetch = 0 : i64, scratch_operands = 0 : i64, tpu.core_type = #tpu.core_type<tc>, window_params = [{transform_indices = @transform_0, window_bounds = array<i64: 16, 48>}, {pipeline_mode = #tpu.pipeline_mode<synchronous>, transform_indices = @transform_1, window_bounds = array<i64: 48, 16>}, {pipeline_mode = #tpu.pipeline_mode<synchronous>, transform_indices = @transform_2, window_bounds = array<i64: 1, 16>}, {transform_indices = @transform_3, window_bounds = array<i64: 16, 16>}]} {
    %c0 = arith.constant 0 : index
    %c0_0 = arith.constant 0 : index
    %0 = vector.load %arg1[%c0, %c0_0] : memref<16x48xf32, #tpu.memory_space<vmem>>, vector<16x48xf32>
    %1 = arith.truncf %0 : vector<16x48xf32> to vector<16x48xbf16>
    %c0_1 = arith.constant 0 : index
    %c0_2 = arith.constant 0 : index
    %2 = vector.load %arg2[%c0_1, %c0_2] : memref<48x16xbf16, #tpu.memory_space<vmem>>, vector<48x16xbf16>
    %cst = arith.constant dense<0.000000e+00> : vector<16x16xf32>
    %3 = tpu.matmul %1, %2, %cst {dimension_numbers = #tpu.dot_dimension_numbers<[1], [0], [0], [1], [0, 0, 1, 1], [], []>} : vector<16x48xbf16>, vector<48x16xbf16>, vector<16x16xf32> -> vector<16x16xf32>
    %c0_3 = arith.constant 0 : index
    %c0_4 = arith.constant 0 : index
    %4 = vector.load %arg3[%c0_3, %c0_4] : memref<1x16xf32, #tpu.memory_space<vmem>>, vector<1x16xf32>
    %5 = vector.broadcast %4 : vector<1x16xf32> to vector<16x16xf32>
    %6 = arith.addf %3, %5 : vector<16x16xf32>
    %c0_5 = arith.constant 0 : index
    %c0_6 = arith.constant 0 : index
    %7 = vector.load %arg4[%c0_5, %c0_6] : memref<16x16xf32, #tpu.memory_space<vmem>>, vector<16x16xf32>
    tpu.vector_store %arg4[%c0_5, %c0_6], %6 {strides = array<i32>} : memref<16x16xf32, #tpu.memory_space<vmem>>, vector<16x16xf32>,
    return
  }
  func.func @transform_0(%arg0: i32) -> (i32, i32) {
    %c0_i32 = arith.constant 0 : i32
    %c0_i32_0 = arith.constant 0 : i32
    return %arg0, %c0_i32 : i32, i32
  }
  func.func @transform_1(%arg0: i32) -> (i32, i32) {
    %c0_i32 = arith.constant 0 : i32
    %c0_i32_0 = arith.constant 0 : i32
    %c0_i32_1 = arith.constant 0 : i32
    return %c0_i32, %c0_i32_0 : i32, i32
  }
  func.func @transform_2(%arg0: i32) -> (i32, i32) {
    %c0_i32 = arith.constant 0 : i32
    %c0_i32_0 = arith.constant 0 : i32
    %c0_i32_1 = arith.constant 0 : i32
    return %c0_i32, %c0_i32_0 : i32, i32
  }
  func.func @transform_3(%arg0: i32) -> (i32, i32) {
    %c0_i32 = arith.constant 0 : i32
    %c0_i32_0 = arith.constant 0 : i32
    return %arg0, %c0_i32 : i32, i32
  }
}

</mosaic_0001>

<bundles_post_ra>
// kernel: tpu_custom_call.1
= control target key start
LH: loop header
LB: loop body
LE: loop exit
PB: predicated region body
PF: predicated region fallthrough
CT: control target
= control target key end

     0   :  { %s386_s12 = smov 0   ;;  %s415_s0 = inlined_call_operand.vmem [shape: f32[32,48], index: 0, kind: input, shape index: {}]   ;;  %s416_s1 = inlined_call_operand.vmem [shape: bf16[48,16], index: 1, kind: input, shape index: {}]   ;;  %s417_s2 = inlined_call_operand.vmem [shape: f32[1,16], index: 2, kind: input, shape index: {}]   ;;  %s418_s3 = inlined_call_operand.vmem [shape: f32[32,16], index: 3, kind: output, shape index: {}]  }
   0x1 LB: > { %s313_s13 = sadd.s32 4294967295, %s362_s12   ;;  %p317_p0 = scmp.ge.s32.totalorder %s362_s12, 1  ;;  %s362_s12 = sphi %s386_s12, %s13_s12  }
   0x2   : > { %p138_p1 = scmp.lt.s32.totalorder %s362_s12, 3 }
   0x4   : > { %p139_p2 = pnand %p317_p0, %p138_p1 }
   0x5   : > { %v353_v0 = vld [vmem:[%s416_s1] sm:$0xff] (!%p139_p2)   ;;  %v364_v1 = vmov (!%p139_p2), 0.0   ;;  %v354_v2 = vld [vmem:[%s416_s1 + $0x8] sm:$0xff] (!%p139_p2)   ;;  %vm365_vm0 = vmmov (!%p139_p2), 0   ;;  %s318_s18 = sshll.u32 (!%p139_p2), %s313_s13, 1  ;;  %v355_v3 = vld [vmem:[%s416_s1 + $0x10] sm:$0xff] (!%p139_p2)  }
   0x6   : > { %142 = sbr.rel (%p139_p2) target bundleno = 236 (0xec), region = 32  ;;  %333 = vmatprep.subr.bf16.mxu0 (!%p139_p2), %v364_v1  ;;  %339 = vmatprep.mubr.msk.bf16.mxu0 (!%p139_p2), %vm365_vm0, %v364_v1  ;;  %p163_p3 = scmp.lt.s32.totalorder (!%p139_p2), %s318_s18, 3  ;;  %vm209_vm1 = vcmask (!%p139_p2), 392192   ;;  %v322_v7 = vld [vmem:[%s417_s2] ss:$0 sm:$0xff] (!%p139_p2)  ;;  %vm254_vm2 = vcmask (!%p139_p2), 130048  }
   0x7   : > { %334 = vmatpush3.bf16.msra.mxu0 (!%p139_p2), %v353_v0 }
   0x8   : > { %335 = vmatprep.subr.bf16.mxu0 (!%p139_p2), %v364_v1 }
   0xb   : > { %336 = vmatpush3.bf16.msra.mxu0 (!%p139_p2), %v354_v2 }
   0xc   : > { %337 = vmatprep.subr.bf16.mxu0 (!%p139_p2), %v364_v1 }
   0xd   : > { %s420_s18 = smov (!%p163_p3, %s318_s18), 3 }
   0xe   : > { %s319_s21 = sshll.u32 %s420_s18, 3 }
   0xf   : > { %s166_s24 = scalar_lea.vmem %s415_s0, %s319_s21  ;;  %338 = vmatpush3.bf16.msra.mxu0 %v355_v3  ;;  %s172_s29 = scalar_lea.vmem %s418_s3, %s319_s21 }
  0x10   : > { %v175_v4 = vld [vmem:[%s166_s24] sm:$0xff]  ;;  %v176_v5 = vld [vmem:[%s166_s24 + $0x8] sm:$0xff] }
  0x11   : > { %v177_v6 = vpack.c.bf16 %v176_v5, %v175_v4 }
  0x13   : > { %340 = vmatmul.mubr.msk.bf16.vlgmr.msra.gmra.mrb[0].mxu0 %vm209_vm1, %v177_v6 }
  0xe6   : > { %v247_v8 = vpop.f32.mrb[0].mxu0 }
  0xe7   : > { %v248_v9 = vadd.f32 %v322_v7, %v247_v8  ;;  %v341_v10 = vpop.f32.mrb[1].mxu0 }
  0xe8   : > { %v250_v11 = vpop.f32.mrb[2].mxu0 }
  0xe9   : > { %255 = vst.msk [vmem:[%s172_s29] sm:$0xff] %vm254_vm2, %v248_v9  ;;  %v251_v12 = vadd.f32 %v322_v7, %v250_v11  ;;  %v342_v13 = vpop.f32.mrb[3].mxu0 }
  0xeb   : > { %256 = vst.msk [vmem:[%s172_s29 + $0x8] sm:$0xff] %vm254_vm2, %v251_v12 }
  0xec PF: > { %s13_s12 = sadd.s32 1, %s362_s12  }
  0xed   : > { %p10_p4 = scmp.ge.s32.totalorder %s13_s12, 4  }
  0xef   :  { %12 = sbr.rel (!%p10_p4) target bundleno = 1 (0x1), region = 62 }

</bundles_post_ra>
